<compile_context>
chip_gen: v5e
topology: v5e:2x2
jax: 0.10.0
libtpu: 0.0.40
codegen_flags: <defaults>
</compile_context>

<pallas_src>
import functools

import jax
import jax.numpy as jnp
from jax import lax
from jax.experimental import pallas as pl
from jax.experimental.pallas import tpu as pltpu


def _fcnn_kernel(x_ref, w1_ref, b1_ref, w2_ref, b2_ref, w3_ref, b3_ref, o_ref,
                 *, chunk_b, num_chunks):
    # Tiny parameters: load once per grid step, stay in vregs.
    w1 = w1_ref[...]          # (16, S)   compute dtype
    w2 = w2_ref[...]          # (32, 16)  compute dtype
    b1 = b1_ref[...]          # (16, 1)   f32
    b2 = b2_ref[...]          # (32, 1)   f32
    w3 = w3_ref[...]          # (32, 1)   f32
    b3 = b3_ref[...]          # (1, 1)    f32

    def body(c, _):
        start = pl.multiple_of(c * chunk_b, chunk_b)
        xc = x_ref[:, pl.ds(start, chunk_b)]                      # (S, chunk)

        # Layer 1 & 2 on the MXU (batch on lanes => lane-dense tiles),
        # bias + ReLU in f32 on the VPU.
        h1 = jnp.dot(w1, xc, preferred_element_type=jnp.float32) + b1
        h1 = jnp.maximum(h1, 0.0)                                 # (16, chunk)
        h2 = jnp.dot(w2, h1.astype(w2.dtype),
                     preferred_element_type=jnp.float32) + b2
        h2 = jnp.maximum(h2, 0.0)                                 # (32, chunk)

        # Layer 3 (32 -> 1): VPU multiply + XLU sublane reduce; avoids an
        # MXU push whose N=1 result would be almost entirely padding.
        y = jnp.sum(h2 * w3, axis=0, keepdims=True) + b3          # (1, chunk)
        o_ref[:, pl.ds(start, chunk_b)] = y.astype(o_ref.dtype)
        return 0

    lax.fori_loop(0, num_chunks, body, 0, unroll=True)


def fcnn_forward(x, params, *, tile_b=2048, chunk_b=512,
                 compute_dtype=jnp.float32):
    """x: (B, stateSize) float32. params in PyTorch nn.Linear layout (out, in)."""
    w1, b1 = params["w1"], params["b1"]   # (16, S), (16,)
    w2, b2 = params["w2"], params["b2"]   # (32, 16), (32,)
    w3, b3 = params["w3"], params["b3"]   # (1, 32), (1,)
    B, S = x.shape

    chunk_b = min(chunk_b, tile_b)
    assert tile_b % 128 == 0 and chunk_b % 128 == 0 and tile_b % chunk_b == 0
    num_chunks = tile_b // chunk_b
    n_tiles = pl.cdiv(B, tile_b)
    b_pad = n_tiles * tile_b

    # Batch-on-lane layout: (B, S) -> (S, B_pad), zero-padded to a whole
    # number of tiles (padded columns are sliced off after the call).
    x_t = jnp.zeros((S, b_pad), compute_dtype).at[:, :B].set(
        x.astype(compute_dtype).T)

    w1c = w1.astype(compute_dtype)                    # (16, S)
    w2c = w2.astype(compute_dtype)                    # (32, 16)
    b1c = b1.reshape(-1, 1).astype(jnp.float32)       # (16, 1)
    b2c = b2.reshape(-1, 1).astype(jnp.float32)       # (32, 1)
    w3c = w3.reshape(-1, 1).astype(jnp.float32)       # (32, 1)  (VPU path)
    b3c = b3.reshape(1, 1).astype(jnp.float32)        # (1, 1)

    const = lambda a: pl.BlockSpec(a.shape, lambda i: (0,) * a.ndim)
    itemsize = jnp.dtype(compute_dtype).itemsize
    param_bytes = sum(int(p.size) * 4 for p in (w1, b1, w2, b2, w3, b3))
    cost = pl.CostEstimate(
        flops=2 * b_pad * (S * 16 + 16 * 32 + 32),
        transcendentals=0,
        bytes_accessed=int(x_t.size) * itemsize + b_pad * 4 + param_bytes,
    )

    out = pl.pallas_call(
        functools.partial(_fcnn_kernel, chunk_b=chunk_b, num_chunks=num_chunks),
        out_shape=jax.ShapeDtypeStruct((1, b_pad), jnp.float32),
        grid=(n_tiles,),
        in_specs=[
            pl.BlockSpec((S, tile_b), lambda i: (0, i)),   # pipelined x tiles
            const(w1c), const(b1c), const(w2c), const(b2c),
            const(w3c), const(b3c),                        # resident params
        ],
        out_specs=pl.BlockSpec((1, tile_b), lambda i: (0, i)),  # lane-dense out
        compiler_params=pltpu.CompilerParams(
            dimension_semantics=("parallel",)),            # megacore on v7x
        cost_estimate=cost,
    )(x_t, w1c, b1c, w2c, b2c, w3c, b3c)

    return out[:, :B].T                                    # (B, 1)


def init_params(key, state_size):
    """nn.Linear default init, PyTorch (out, in) weight layout."""
    dims = [(state_size, 16), (16, 32), (32, 1)]
    params = {}
    for i, (fan_in, fan_out) in enumerate(dims, start=1):
        key, kw, kb = jax.random.split(key, 3)
        bound = 1.0 / jnp.sqrt(jnp.float32(fan_in))
        params[f"w{i}"] = jax.random.uniform(
            kw, (fan_out, fan_in), jnp.float32, minval=-bound, maxval=bound)
        params[f"b{i}"] = jax.random.uniform(
            kb, (fan_out,), jnp.float32, minval=-bound, maxval=bound)
    return params


def reference_forward(x, params):
    h = jnp.maximum(x @ params["w1"].T + params["b1"], 0.0)
    h = jnp.maximum(h @ params["w2"].T + params["b2"], 0.0)
    return h @ params["w3"].T + params["b3"]


if __name__ == "__main__":
    key = jax.random.PRNGKey(0)
    state_size = 4
    batch = 8

    kx, kp = jax.random.split(key)
    x = jax.random.normal(kx, (batch, state_size), jnp.float32)
    params = init_params(kp, state_size)

    out = jax.block_until_ready(fcnn_forward(x, params))
    ref = reference_forward(x, params)

    assert out.shape == (batch, 1)
    assert jnp.allclose(out, ref, atol=1e-5, rtol=1e-5), \
        float(jnp.max(jnp.abs(out - ref)))

    print("KERNEL_OK")
</pallas_src>

<mosaic_0001>
module attributes {stable_mosaic.version = 11 : i64} {
  func.func @_fcnn_kernel(%arg0: i32, %arg1: memref<4x2048xf32, #tpu.memory_space<vmem>>, %arg2: memref<16x4xf32, #tpu.memory_space<vmem>>, %arg3: memref<16x1xf32, #tpu.memory_space<vmem>>, %arg4: memref<32x16xf32, #tpu.memory_space<vmem>>, %arg5: memref<32x1xf32, #tpu.memory_space<vmem>>, %arg6: memref<32x1xf32, #tpu.memory_space<vmem>>, %arg7: memref<1x1xf32, #tpu.memory_space<vmem>>, %arg8: memref<1x2048xf32, #tpu.memory_space<vmem>>) attributes {dimension_semantics = [#tpu.dimension_semantics<parallel>], iteration_bounds = array<i64: 1>, scalar_prefetch = 0 : i64, scratch_operands = 0 : i64, tpu.core_type = #tpu.core_type<tc>, window_params = [{transform_indices = @transform_0, window_bounds = array<i64: 4, 2048>}, {pipeline_mode = #tpu.pipeline_mode<synchronous>, transform_indices = @transform_1, window_bounds = array<i64: 16, 4>}, {pipeline_mode = #tpu.pipeline_mode<synchronous>, transform_indices = @transform_2, window_bounds = array<i64: 16, 1>}, {pipeline_mode = #tpu.pipeline_mode<synchronous>, transform_indices = @transform_3, window_bounds = array<i64: 32, 16>}, {pipeline_mode = #tpu.pipeline_mode<synchronous>, transform_indices = @transform_4, window_bounds = array<i64: 32, 1>}, {pipeline_mode = #tpu.pipeline_mode<synchronous>, transform_indices = @transform_5, window_bounds = array<i64: 32, 1>}, {pipeline_mode = #tpu.pipeline_mode<synchronous>, transform_indices = @transform_6, window_bounds = array<i64: 1, 1>}, {transform_indices = @transform_7, window_bounds = array<i64: 1, 2048>}]} {
    %c0 = arith.constant 0 : index
    %c0_0 = arith.constant 0 : index
    %0 = vector.load %arg2[%c0, %c0_0] : memref<16x4xf32, #tpu.memory_space<vmem>>, vector<16x4xf32>
    %c0_1 = arith.constant 0 : index
    %c0_2 = arith.constant 0 : index
    %1 = vector.load %arg4[%c0_1, %c0_2] : memref<32x16xf32, #tpu.memory_space<vmem>>, vector<32x16xf32>
    %c0_3 = arith.constant 0 : index
    %c0_4 = arith.constant 0 : index
    %2 = vector.load %arg3[%c0_3, %c0_4] : memref<16x1xf32, #tpu.memory_space<vmem>>, vector<16x1xf32>
    %c0_5 = arith.constant 0 : index
    %c0_6 = arith.constant 0 : index
    %3 = vector.load %arg5[%c0_5, %c0_6] : memref<32x1xf32, #tpu.memory_space<vmem>>, vector<32x1xf32>
    %c0_7 = arith.constant 0 : index
    %c0_8 = arith.constant 0 : index
    %4 = vector.load %arg6[%c0_7, %c0_8] : memref<32x1xf32, #tpu.memory_space<vmem>>, vector<32x1xf32>
    %c0_9 = arith.constant 0 : index
    %c0_10 = arith.constant 0 : index
    %5 = vector.load %arg7[%c0_9, %c0_10] : memref<1x1xf32, #tpu.memory_space<vmem>>, vector<1x1xf32>
    %c0_i32 = arith.constant 0 : i32
    %c512_i32 = arith.constant 512 : i32
    %6 = arith.muli %c0_i32, %c512_i32 : i32
    %7 = tpu.assume_multiple %6, 512 : i32
    %c0_11 = arith.constant 0 : index
    %8 = arith.index_cast %7 : i32 to index
    %9 = vector.load %arg1[%c0_11, %8] : memref<4x2048xf32, #tpu.memory_space<vmem>>, vector<4x512xf32>
    %cst = arith.constant dense<0.000000e+00> : vector<16x512xf32>
    %10 = tpu.matmul %0, %9, %cst {dimension_numbers = #tpu.dot_dimension_numbers<[1], [0], [0], [1], [0, 0, 1, 1], [], []>} : vector<16x4xf32>, vector<4x512xf32>, vector<16x512xf32> -> vector<16x512xf32>
    %11 = vector.broadcast %2 : vector<16x1xf32> to vector<16x512xf32>
    %12 = arith.addf %10, %11 : vector<16x512xf32>
    %cst_12 = arith.constant 0.000000e+00 : f32
    %13 = vector.broadcast %cst_12 : f32 to vector<16x512xf32>
    %14 = arith.maximumf %12, %13 : vector<16x512xf32>
    %cst_13 = arith.constant dense<0.000000e+00> : vector<32x512xf32>
    %15 = tpu.matmul %1, %14, %cst_13 {dimension_numbers = #tpu.dot_dimension_numbers<[1], [0], [0], [1], [0, 0, 1, 1], [], []>} : vector<32x16xf32>, vector<16x512xf32>, vector<32x512xf32> -> vector<32x512xf32>
    %16 = vector.broadcast %3 : vector<32x1xf32> to vector<32x512xf32>
    %17 = arith.addf %15, %16 : vector<32x512xf32>
    %cst_14 = arith.constant 0.000000e+00 : f32
    %18 = vector.broadcast %cst_14 : f32 to vector<32x512xf32>
    %19 = arith.maximumf %17, %18 : vector<32x512xf32>
    %20 = vector.broadcast %4 : vector<32x1xf32> to vector<32x512xf32>
    %21 = arith.mulf %19, %20 : vector<32x512xf32>
    %cst_15 = arith.constant dense<0.000000e+00> : vector<512xf32>
    %22 = vector.multi_reduction <add>, %21, %cst_15 [0] : vector<32x512xf32> to vector<512xf32>
    %23 = vector.shape_cast %22 : vector<512xf32> to vector<1x512xf32>
    %24 = vector.broadcast %5 : vector<1x1xf32> to vector<1x512xf32>
    %25 = arith.addf %23, %24 : vector<1x512xf32>
    %c0_16 = arith.constant 0 : index
    %26 = arith.index_cast %7 : i32 to index
    %27 = vector.load %arg8[%c0_16, %26] : memref<1x2048xf32, #tpu.memory_space<vmem>>, vector<1x512xf32>
    tpu.vector_store %arg8[%c0_16, %26], %25 {strides = array<i32>} : memref<1x2048xf32, #tpu.memory_space<vmem>>, vector<1x512xf32>,
    %c1_i32 = arith.constant 1 : i32
    %c512_i32_17 = arith.constant 512 : i32
    %28 = arith.muli %c1_i32, %c512_i32_17 : i32
    %29 = tpu.assume_multiple %28, 512 : i32
    %c0_18 = arith.constant 0 : index
    %30 = arith.index_cast %29 : i32 to index
    %31 = vector.load %arg1[%c0_18, %30] : memref<4x2048xf32, #tpu.memory_space<vmem>>, vector<4x512xf32>
    %cst_19 = arith.constant dense<0.000000e+00> : vector<16x512xf32>
    %32 = tpu.matmul %0, %31, %cst_19 {dimension_numbers = #tpu.dot_dimension_numbers<[1], [0], [0], [1], [0, 0, 1, 1], [], []>} : vector<16x4xf32>, vector<4x512xf32>, vector<16x512xf32> -> vector<16x512xf32>
    %33 = vector.broadcast %2 : vector<16x1xf32> to vector<16x512xf32>
    %34 = arith.addf %32, %33 : vector<16x512xf32>
    %cst_20 = arith.constant 0.000000e+00 : f32
    %35 = vector.broadcast %cst_20 : f32 to vector<16x512xf32>
    %36 = arith.maximumf %34, %35 : vector<16x512xf32>
    %cst_21 = arith.constant dense<0.000000e+00> : vector<32x512xf32>
    %37 = tpu.matmul %1, %36, %cst_21 {dimension_numbers = #tpu.dot_dimension_numbers<[1], [0], [0], [1], [0, 0, 1, 1], [], []>} : vector<32x16xf32>, vector<16x512xf32>, vector<32x512xf32> -> vector<32x512xf32>
    %38 = vector.broadcast %3 : vector<32x1xf32> to vector<32x512xf32>
    %39 = arith.addf %37, %38 : vector<32x512xf32>
    %cst_22 = arith.constant 0.000000e+00 : f32
    %40 = vector.broadcast %cst_22 : f32 to vector<32x512xf32>
    %41 = arith.maximumf %39, %40 : vector<32x512xf32>
    %42 = vector.broadcast %4 : vector<32x1xf32> to vector<32x512xf32>
    %43 = arith.mulf %41, %42 : vector<32x512xf32>
    %cst_23 = arith.constant dense<0.000000e+00> : vector<512xf32>
    %44 = vector.multi_reduction <add>, %43, %cst_23 [0] : vector<32x512xf32> to vector<512xf32>
    %45 = vector.shape_cast %44 : vector<512xf32> to vector<1x512xf32>
    %46 = vector.broadcast %5 : vector<1x1xf32> to vector<1x512xf32>
    %47 = arith.addf %45, %46 : vector<1x512xf32>
    %c0_24 = arith.constant 0 : index
    %48 = arith.index_cast %29 : i32 to index
    %49 = vector.load %arg8[%c0_24, %48] : memref<1x2048xf32, #tpu.memory_space<vmem>>, vector<1x512xf32>
    tpu.vector_store %arg8[%c0_24, %48], %47 {strides = array<i32>} : memref<1x2048xf32, #tpu.memory_space<vmem>>, vector<1x512xf32>,
    %c2_i32 = arith.constant 2 : i32
    %c512_i32_25 = arith.constant 512 : i32
    %50 = arith.muli %c2_i32, %c512_i32_25 : i32
    %51 = tpu.assume_multiple %50, 512 : i32
    %c0_26 = arith.constant 0 : index
    %52 = arith.index_cast %51 : i32 to index
    %53 = vector.load %arg1[%c0_26, %52] : memref<4x2048xf32, #tpu.memory_space<vmem>>, vector<4x512xf32>
    %cst_27 = arith.constant dense<0.000000e+00> : vector<16x512xf32>
    %54 = tpu.matmul %0, %53, %cst_27 {dimension_numbers = #tpu.dot_dimension_numbers<[1], [0], [0], [1], [0, 0, 1, 1], [], []>} : vector<16x4xf32>, vector<4x512xf32>, vector<16x512xf32> -> vector<16x512xf32>
    %55 = vector.broadcast %2 : vector<16x1xf32> to vector<16x512xf32>
    %56 = arith.addf %54, %55 : vector<16x512xf32>
    %cst_28 = arith.constant 0.000000e+00 : f32
    %57 = vector.broadcast %cst_28 : f32 to vector<16x512xf32>
    %58 = arith.maximumf %56, %57 : vector<16x512xf32>
    %cst_29 = arith.constant dense<0.000000e+00> : vector<32x512xf32>
    %59 = tpu.matmul %1, %58, %cst_29 {dimension_numbers = #tpu.dot_dimension_numbers<[1], [0], [0], [1], [0, 0, 1, 1], [], []>} : vector<32x16xf32>, vector<16x512xf32>, vector<32x512xf32> -> vector<32x512xf32>
    %60 = vector.broadcast %3 : vector<32x1xf32> to vector<32x512xf32>
    %61 = arith.addf %59, %60 : vector<32x512xf32>
    %cst_30 = arith.constant 0.000000e+00 : f32
    %62 = vector.broadcast %cst_30 : f32 to vector<32x512xf32>
    %63 = arith.maximumf %61, %62 : vector<32x512xf32>
    %64 = vector.broadcast %4 : vector<32x1xf32> to vector<32x512xf32>
    %65 = arith.mulf %63, %64 : vector<32x512xf32>
    %cst_31 = arith.constant dense<0.000000e+00> : vector<512xf32>
    %66 = vector.multi_reduction <add>, %65, %cst_31 [0] : vector<32x512xf32> to vector<512xf32>
    %67 = vector.shape_cast %66 : vector<512xf32> to vector<1x512xf32>
    %68 = vector.broadcast %5 : vector<1x1xf32> to vector<1x512xf32>
    %69 = arith.addf %67, %68 : vector<1x512xf32>
    %c0_32 = arith.constant 0 : index
    %70 = arith.index_cast %51 : i32 to index
    %71 = vector.load %arg8[%c0_32, %70] : memref<1x2048xf32, #tpu.memory_space<vmem>>, vector<1x512xf32>
    tpu.vector_store %arg8[%c0_32, %70], %69 {strides = array<i32>} : memref<1x2048xf32, #tpu.memory_space<vmem>>, vector<1x512xf32>,
    %c3_i32 = arith.constant 3 : i32
    %c512_i32_33 = arith.constant 512 : i32
    %72 = arith.muli %c3_i32, %c512_i32_33 : i32
    %73 = tpu.assume_multiple %72, 512 : i32
    %c0_34 = arith.constant 0 : index
    %74 = arith.index_cast %73 : i32 to index
    %75 = vector.load %arg1[%c0_34, %74] : memref<4x2048xf32, #tpu.memory_space<vmem>>, vector<4x512xf32>
    %cst_35 = arith.constant dense<0.000000e+00> : vector<16x512xf32>
    %76 = tpu.matmul %0, %75, %cst_35 {dimension_numbers = #tpu.dot_dimension_numbers<[1], [0], [0], [1], [0, 0, 1, 1], [], []>} : vector<16x4xf32>, vector<4x512xf32>, vector<16x512xf32> -> vector<16x512xf32>
    %77 = vector.broadcast %2 : vector<16x1xf32> to vector<16x512xf32>
    %78 = arith.addf %76, %77 : vector<16x512xf32>
    %cst_36 = arith.constant 0.000000e+00 : f32
    %79 = vector.broadcast %cst_36 : f32 to vector<16x512xf32>
    %80 = arith.maximumf %78, %79 : vector<16x512xf32>
    %cst_37 = arith.constant dense<0.000000e+00> : vector<32x512xf32>
    %81 = tpu.matmul %1, %80, %cst_37 {dimension_numbers = #tpu.dot_dimension_numbers<[1], [0], [0], [1], [0, 0, 1, 1], [], []>} : vector<32x16xf32>, vector<16x512xf32>, vector<32x512xf32> -> vector<32x512xf32>
    %82 = vector.broadcast %3 : vector<32x1xf32> to vector<32x512xf32>
    %83 = arith.addf %81, %82 : vector<32x512xf32>
    %cst_38 = arith.constant 0.000000e+00 : f32
    %84 = vector.broadcast %cst_38 : f32 to vector<32x512xf32>
    %85 = arith.maximumf %83, %84 : vector<32x512xf32>
    %86 = vector.broadcast %4 : vector<32x1xf32> to vector<32x512xf32>
    %87 = arith.mulf %85, %86 : vector<32x512xf32>
    %cst_39 = arith.constant dense<0.000000e+00> : vector<512xf32>
    %88 = vector.multi_reduction <add>, %87, %cst_39 [0] : vector<32x512xf32> to vector<512xf32>
    %89 = vector.shape_cast %88 : vector<512xf32> to vector<1x512xf32>
    %90 = vector.broadcast %5 : vector<1x1xf32> to vector<1x512xf32>
    %91 = arith.addf %89, %90 : vector<1x512xf32>
    %c0_40 = arith.constant 0 : index
    %92 = arith.index_cast %73 : i32 to index
    %93 = vector.load %arg8[%c0_40, %92] : memref<1x2048xf32, #tpu.memory_space<vmem>>, vector<1x512xf32>
    tpu.vector_store %arg8[%c0_40, %92], %91 {strides = array<i32>} : memref<1x2048xf32, #tpu.memory_space<vmem>>, vector<1x512xf32>,
    %c4_i32 = arith.constant 4 : i32
    return
  }
  func.func @transform_0(%arg0: i32) -> (i32, i32) {
    %c0_i32 = arith.constant 0 : i32
    %c0_i32_0 = arith.constant 0 : i32
    return %c0_i32, %arg0 : i32, i32
  }
  func.func @transform_1(%arg0: i32) -> (i32, i32) {
    %c0_i32 = arith.constant 0 : i32
    %c0_i32_0 = arith.constant 0 : i32
    %c0_i32_1 = arith.constant 0 : i32
    return %c0_i32, %c0_i32_0 : i32, i32
  }
  func.func @transform_2(%arg0: i32) -> (i32, i32) {
    %c0_i32 = arith.constant 0 : i32
    %c0_i32_0 = arith.constant 0 : i32
    %c0_i32_1 = arith.constant 0 : i32
    return %c0_i32, %c0_i32_0 : i32, i32
  }
  func.func @transform_3(%arg0: i32) -> (i32, i32) {
    %c0_i32 = arith.constant 0 : i32
    %c0_i32_0 = arith.constant 0 : i32
    %c0_i32_1 = arith.constant 0 : i32
    return %c0_i32, %c0_i32_0 : i32, i32
  }
  func.func @transform_4(%arg0: i32) -> (i32, i32) {
    %c0_i32 = arith.constant 0 : i32
    %c0_i32_0 = arith.constant 0 : i32
    %c0_i32_1 = arith.constant 0 : i32
    return %c0_i32, %c0_i32_0 : i32, i32
  }
  func.func @transform_5(%arg0: i32) -> (i32, i32) {
    %c0_i32 = arith.constant 0 : i32
    %c0_i32_0 = arith.constant 0 : i32
    %c0_i32_1 = arith.constant 0 : i32
    return %c0_i32, %c0_i32_0 : i32, i32
  }
  func.func @transform_6(%arg0: i32) -> (i32, i32) {
    %c0_i32 = arith.constant 0 : i32
    %c0_i32_0 = arith.constant 0 : i32
    %c0_i32_1 = arith.constant 0 : i32
    return %c0_i32, %c0_i32_0 : i32, i32
  }
  func.func @transform_7(%arg0: i32) -> (i32, i32) {
    %c0_i32 = arith.constant 0 : i32
    %c0_i32_0 = arith.constant 0 : i32
    return %c0_i32, %arg0 : i32, i32
  }
}

</mosaic_0001>

<bundles_post_ra>
// kernel: tpu_custom_call.1
= control target key start
LH: loop header
LB: loop body
LE: loop exit
PB: predicated region body
PF: predicated region fallthrough
CT: control target
= control target key end

     0   :  { %s2149_s0 = inlined_call_operand.vmem [shape: f32[4,2048], index: 0, kind: input, shape index: {}]   ;;  %s2150_s1 = inlined_call_operand.vmem [shape: f32[16,4], index: 1, kind: input, shape index: {}]   ;;  %s2151_s2 = inlined_call_operand.vmem [shape: f32[16,1], index: 2, kind: input, shape index: {}]   ;;  %s2152_s3 = inlined_call_operand.vmem [shape: f32[32,16], index: 3, kind: input, shape index: {}]   ;;  %s2153_s4 = inlined_call_operand.vmem [shape: f32[32,1], index: 4, kind: input, shape index: {}]   ;;  %s2154_s5 = inlined_call_operand.vmem [shape: f32[32,1], index: 5, kind: input, shape index: {}]   ;;  %s2155_s6 = inlined_call_operand.<no memory space> [shape: f32[1,1], index: 6, kind: input, shape index: {}]   ;;  %s2156_s7 = inlined_call_operand.hbm [shape: f32[1,2048], index: 7, kind: output, shape index: {}]  }
   0x1   :  { %v12_v0 = vstv %s2155_s6 }
   0x2   :  { %13 = vst [vmem:[#allocation2] sm:$0x1] %v12_v0 }
   0x3   :  { %v36_v1 = vld [vmem:[%s2151_s2 + $0x8] sm:$0xff]  ;;  %v46_v2 = vld [vmem:[%s2149_s0] sm:$0xff]  ;;  %v1581_v3 = vmov 0  }
   0x4   :  { %1548 = vset.pattern.permute.xlu0 %v1581_v3  ;;  %60 = vst [vmem:[#allocation1] ss:$2 sm:$0xff] %v46_v2  ;;  %v47_v4 = vld [vmem:[%s2149_s0 + $0x8] sm:$0xff]  ;;  %1549 = vset.pattern.permute.xlu1 %v1581_v3 }
   0x5   :  { %55 = vperm.xlu0 %1548, %v36_v1   ;;  %62 = vst [vmem:[#allocation1 + $0x10] ss:$2 sm:$0xff] %v47_v4  ;;  %1550 = vset.pattern.permute.xlu2 %v1581_v3 }
   0x6   :  { %14 = vsyncpa [#allocation4], 0  ;;  %vm74_vm0 = vcmask 1043456   ;;  %v1456_v5 = vld [vmem:[%s2149_s0 + $0x10] sm:$0xff]  ;;  %v1457_v6 = vld [vmem:[%s2149_s0 + $0x18] sm:$0xff]  ;;  %vm67_vm1 = vcmask 31744  }
   0x7   :  { %v1644_v7 = vld [vmem:[%s2150_s1] sm:$0xff]  ;;  %v1664_v13 = vld [vmem:[%s2150_s1 + $0x8] sm:$0xff]  ;;  %v44_v15 = vld [vmem:[%s2154_s5 + $0x18] sm:$0xff]  ;;  %vm203_vm2 = vcmask 130048   ;;  %vm437_vm3 = vcmask 1040384   ;;  %vm439_vm4 = vcmask 1042434  }
   0x8   :  { %v35_v12 = vld [vmem:[%s2151_s2] sm:$0xff]  ;;  %v38_v19 = vld [vmem:[%s2153_s4 + $0x8] sm:$0xff]  ;;  %v39_v53 = vld [vmem:[%s2153_s4 + $0x10] sm:$0xff]  ;;  %vm441_vm5 = vcmask 1041408   ;;  %s1419_s30 = sshll.u32 %s2156_s7, 4  ;;  %s1420_s30 = int_to_ptr.hbm [resolvable:$true] %s1419_s30 }
   0x9   :  { %v41_v14 = vld [vmem:[%s2154_s5] sm:$0xff]  ;;  %v1487_v23 = vld [vmem:[%s2149_s0 + $0x28] sm:$0xff]  ;;  %195 = vperm.xlu2 %1550, %v39_v53   ;;  %v1739_v54 = vld [vmem:[%s2152_s3 + $0x10] sm:$0xff] }
   0xa   :  { %v37_v16 = vld [vmem:[%s2153_s4] sm:$0xff]  ;;  %v42_v26 = vld [vmem:[%s2154_s5 + $0x8] sm:$0xff]  ;;  %v40_v55 = vld [vmem:[%s2153_s4 + $0x18] sm:$0xff] }
   0xb   :  { %v63_v8 = vld.sshfl [vmem:[#allocation1] sm:$0xff pattern:$0x75316420]  ;;  %v64_v9 = vld.sshfl [vmem:[#allocation1 + $0x8] sm:$0xff pattern:$0x75316420]  ;;  %185 = vperm.xlu1 %1549, %v37_v16  }
   0xc   :  { %1428 = vmatpush.msk.msra.mxu0 %vm74_vm0, %v63_v8  ;;  %1431 = vmatpush.msk.msra.mxu1 %vm74_vm0, %v64_v9  ;;  %454 = vst [vmem:[#allocation1] ss:$2 sm:$0xff] %v1456_v5  ;;  %v65_v10 = vld.sshfl [vmem:[#allocation1 + $0x10] sm:$0xff pattern:$0x75316420]  ;;  %v1703_v37 = vld [vmem:[%s2152_s3] sm:$0xff] }
   0xd   :  { %1434 = vmatpush.msk.msra.mxu2 %vm74_vm0, %v65_v10  ;;  %v66_v11 = vld.sshfl [vmem:[#allocation1 + $0x18] sm:$0xff pattern:$0x75316420]  ;;  %1429 = vmatmul.msk.f32.vlgmr.msra.gmra.mxu0 %vm67_vm1, %v1644_v7  ;;  %v1486_v47 = vld [vmem:[%s2149_s0 + $0x20] sm:$0xff]  ;;  %v1721_v52 = vld [vmem:[%s2152_s3 + $0x8] sm:$0xff] }
   0xe   :  { %1437 = vmatpush.msk.msra.mxu3 %vm74_vm0, %v66_v11  ;;  %456 = vst [vmem:[#allocation1 + $0x10] ss:$2 sm:$0xff] %v1457_v6  ;;  %1432 = vmatmul.msk.f32.vlgmr.msra.gmra.mxu1 %vm67_vm1, %v1644_v7  ;;  %v45_v56 = vld [vmem:[#allocation2] sm:$0x1]  ;;  %v1755_v57 = vld [vmem:[%s2152_s3 + $0x18] sm:$0xff]  ;;  %v43_v58 = vld [vmem:[%s2154_s5 + $0x10] sm:$0xff] }
   0xf   :  { %1435 = vmatmul.msk.f32.vlgmr.msra.gmra.mxu2 %vm67_vm1, %v1644_v7  ;;  %1438 = vmatmul.msk.f32.vlgmr.msra.gmra.mxu3 %vm67_vm1, %v1644_v7 }
  0x10   :  { %50 = vperm.xlu0 %1548, %v35_v12  }
  0x11   :  { %200 = vperm.xlu2 %1550, %v40_v55  }
  0x13   :  { %190 = vperm.xlu1 %1549, %v38_v19   ;;  %v457_v42 = vld.sshfl [vmem:[#allocation1] sm:$0xff pattern:$0x75316420]  ;;  %v458_v43 = vld.sshfl [vmem:[#allocation1 + $0x8] sm:$0xff pattern:$0x75316420] }
  0x14   :  { %775 = vst [vmem:[#allocation1] ss:$2 sm:$0xff] %v1486_v47 }
  0x15   :  { %1430 = vmatmul.msk.f32.gmra.mxu0 %vm67_vm1, %v1664_v13  ;;  %v459_v21 = vld.sshfl [vmem:[#allocation1 + $0x10] sm:$0xff pattern:$0x75316420]  ;;  %v460_v22 = vld.sshfl [vmem:[#allocation1 + $0x18] sm:$0xff pattern:$0x75316420] }
  0x16   :  { %1433 = vmatmul.msk.f32.gmra.mxu1 %vm67_vm1, %v1664_v13  ;;  %777 = vst [vmem:[#allocation1 + $0x10] ss:$2 sm:$0xff] %v1487_v23 }
  0x17   :  { %1436 = vmatmul.msk.f32.gmra.mxu2 %vm67_vm1, %v1664_v13  ;;  %1439 = vmatmul.msk.f32.gmra.mxu3 %vm67_vm1, %v1664_v13 }
  0x18   :  { %350 = vperm.xlu0 %1548, %v41_v14  }
  0x19   :  { %360 = vperm.xlu2 %1550, %v43_v58  }
  0x1b   :  { %355 = vperm.xlu1 %1549, %v42_v26  }
  0x20   :  { %365 = vperm.xlu0 %1548, %v44_v15  }
  0x23   :  { %422 = vperm.xlu1 %1549, %v45_v56  }
  0x63   :  { %v1790_v62 = vpop.permute.xlu2 %195 }
  0x6b   :  { %v1794_v2 = vpop.permute.xlu2 %200 }
  0x73   :  { %v1806_v26 = vpop.permute.xlu2 %360 }
  0x77   :  { %v1683_v17 = vpop.permute.xlu0 %55 }
  0x7d   :  { %v1788_v59 = vpop.permute.xlu1 %185 }
  0x82   :  { %v1694_v27 = vpop.permute.xlu0 %50 }
  0x85   :  { %v1792_v1 = vpop.permute.xlu1 %190 }
  0x8a   :  { %v100_v18 = vpop.f32.mrf.mxu0  ;;  %v1800_v12 = vpop.permute.xlu0 %350 }
  0x8b   :  { %v123_v20 = vpop.f32.mrf.mxu1  ;;  %v101_v29 = vadd.f32 %v100_v18, %v1694_v27 }
  0x8c   :  { %v124_v32 = vadd.f32 %v123_v20, %v1694_v27 }
  0x8d   :  { %v175_v36 = vmax.f32 %v101_v29, 0.0  ;;  %v1804_v19 = vpop.permute.xlu1 %355 }
  0x8e   :  { %v176_v38 = vmax.f32 %v124_v32, 0.0 }
  0x92   :  { %v146_v24 = vpop.f32.mrf.mxu2  ;;  %v169_v25 = vpop.f32.mrf.mxu3 }
  0x93   :  { %v103_v28 = vpop.f32.mrf.mxu0  ;;  %v126_v31 = vpop.f32.mrf.mxu1  ;;  %v147_v39 = vadd.f32 %v146_v24, %v1694_v27  ;;  %v170_v44 = vadd.f32 %v169_v25, %v1694_v27 }
  0x94   :  { %v104_v30 = vadd.f32 %v103_v28, %v1683_v17  ;;  %v127_v33 = vadd.f32 %v126_v31, %v1683_v17 }
  0x95   :  { %v177_v50 = vmax.f32 %v147_v39, 0.0  ;;  %v178_v51 = vmax.f32 %v170_v44, 0.0 }
  0x96   :  { %v179_v34 = vmax.f32 %v104_v30, 0.0  ;;  %v180_v35 = vmax.f32 %v127_v33, 0.0 }
  0x98   :  { %230 = vmatpush.msrb.mxu0 %v179_v34  ;;  %259 = vmatpush.msrb.mxu1 %v180_v35 }
  0x9a   :  { %v149_v40 = vpop.f32.mrf.mxu2  ;;  %v172_v41 = vpop.f32.mrf.mxu3  ;;  %231 = vmatpush.msrb.mxu0 %v175_v36  ;;  %260 = vmatpush.msrb.mxu1 %v176_v38 }
  0x9b   :  { %v150_v45 = vadd.f32 %v149_v40, %v1683_v17  ;;  %v173_v46 = vadd.f32 %v172_v41, %v1683_v17  ;;  %1440 = vmatmul.msk.f32.vlgmr.msrb.gmra.mxu0 %vm203_vm2, %v1703_v37  ;;  %1444 = vmatmul.msk.f32.vlgmr.msrb.gmra.mxu1 %vm203_vm2, %v1703_v37 }
  0x9c   :  { %1458 = vmatpush.msk.msra.mxu0 %vm74_vm0, %v457_v42  ;;  %1461 = vmatpush.msk.msra.mxu1 %vm74_vm0, %v458_v43  ;;  %v1817_v42 = vpop.permute.xlu0 %365 }
  0x9d   :  { %v181_v48 = vmax.f32 %v150_v45, 0.0  ;;  %v182_v49 = vmax.f32 %v173_v46, 0.0 }
  0x9f   :  { %288 = vmatpush.msrb.mxu2 %v181_v48  ;;  %317 = vmatpush.msrb.mxu3 %v182_v49 }
  0xa1   :  { %289 = vmatpush.msrb.mxu2 %v177_v50  ;;  %318 = vmatpush.msrb.mxu3 %v178_v51 }
  0xa2   :  { %1448 = vmatmul.msk.f32.vlgmr.msrb.gmra.mxu2 %vm203_vm2, %v1703_v37  ;;  %1452 = vmatmul.msk.f32.vlgmr.msrb.gmra.mxu3 %vm203_vm2, %v1703_v37 }
  0xa3   :  { %1441 = vmatmul.msk.f32.gmra.mxu0 %vm203_vm2, %v1721_v52  ;;  %1464 = vmatpush.msk.msra.mxu2 %vm74_vm0, %v459_v21 }
  0xa4   :  { %1445 = vmatmul.msk.f32.gmra.mxu1 %vm203_vm2, %v1721_v52  ;;  %1467 = vmatpush.msk.msra.mxu3 %vm74_vm0, %v460_v22 }
  0xaa   :  { %1449 = vmatmul.msk.f32.gmra.mxu2 %vm203_vm2, %v1721_v52  ;;  %1453 = vmatmul.msk.f32.gmra.mxu3 %vm203_vm2, %v1721_v52 }
  0xab   :  { %1442 = vmatmul.msk.f32.gmra.mxu0 %vm203_vm2, %v1739_v54 }
  0xac   :  { %1446 = vmatmul.msk.f32.gmra.mxu1 %vm203_vm2, %v1739_v54 }
  0xb2   :  { %1450 = vmatmul.msk.f32.gmra.mxu2 %vm203_vm2, %v1739_v54  ;;  %1454 = vmatmul.msk.f32.gmra.mxu3 %vm203_vm2, %v1739_v54 }
  0xb3   :  { %1443 = vmatmul.msk.f32.gmra.mxu0 %vm203_vm2, %v1755_v57 }
  0xb4   :  { %1447 = vmatmul.msk.f32.gmra.mxu1 %vm203_vm2, %v1755_v57 }
  0xba   :  { %1451 = vmatmul.msk.f32.gmra.mxu2 %vm203_vm2, %v1755_v57  ;;  %1455 = vmatmul.msk.f32.gmra.mxu3 %vm203_vm2, %v1755_v57 }
  0xbb   :  { %1459 = vmatmul.msk.f32.vlgmr.msra.gmra.mxu0 %vm67_vm1, %v1644_v7 }
  0xbc   :  { %1462 = vmatmul.msk.f32.vlgmr.msra.gmra.mxu1 %vm67_vm1, %v1644_v7 }
  0xc2   :  { %1465 = vmatmul.msk.f32.vlgmr.msra.gmra.mxu2 %vm67_vm1, %v1644_v7  ;;  %1468 = vmatmul.msk.f32.vlgmr.msra.gmra.mxu3 %vm67_vm1, %v1644_v7 }
  0xc3   :  { %1460 = vmatmul.msk.f32.gmra.mxu0 %vm67_vm1, %v1664_v13 }
  0xc4   :  { %1463 = vmatmul.msk.f32.gmra.mxu1 %vm67_vm1, %v1664_v13 }
  0xca   :  { %1466 = vmatmul.msk.f32.gmra.mxu2 %vm67_vm1, %v1664_v13  ;;  %1469 = vmatmul.msk.f32.gmra.mxu3 %vm67_vm1, %v1664_v13 }
 0x118   :  { %v233_v60 = vpop.f32.mrf.mxu0  ;;  %v262_v61 = vpop.f32.mrf.mxu1 }
 0x119   :  { %v234_v9 = vadd.f32 %v233_v60, %v1788_v59  ;;  %v263_v14 = vadd.f32 %v262_v61, %v1788_v59 }
 0x11b   :  { %v332_v20 = vmax.f32 %v234_v9, 0.0  ;;  %v333_v24 = vmax.f32 %v263_v14, 0.0 }
 0x11d   :  { %v368_v31 = vmul.f32 %v1800_v12, %v332_v20  ;;  %v369_v35 = vmul.f32 %v1800_v12, %v333_v24 }
 0x120   :  { %v236_v63 = vpop.f32.mrf.mxu0 }
 0x121   :  { %v265_v0 = vpop.f32.mrf.mxu1  ;;  %v237_v5 = vadd.f32 %v236_v63, %v1792_v1 }
 0x122   :  { %v266_v6 = vadd.f32 %v265_v0, %v1792_v1 }
 0x123   :  { %v336_v16 = vmax.f32 %v237_v5, 0.0 }
 0x124   :  { %v337_v18 = vmax.f32 %v266_v6, 0.0 }
 0x125   :  { %v291_v3 = vpop.f32.mrf.mxu2  ;;  %v320_v4 = vpop.f32.mrf.mxu3  ;;  %v372_v28 = vmul.f32 %v1804_v19, %v336_v16 }
 0x126   :  { %v373_v30 = vmul.f32 %v1804_v19, %v337_v18  ;;  %v292_v46 = vadd.f32 %v291_v3, %v1788_v59  ;;  %v321_v47 = vadd.f32 %v320_v4, %v1788_v59 }
 0x127   :  { %v384_v41 = vadd.f32 %v372_v28, %v368_v31 }
 0x128   :  { %v239_v8 = vpop.f32.mrf.mxu0  ;;  %v393_v45 = vadd.f32 %v373_v30, %v369_v35  ;;  %v334_v3 = vmax.f32 %v292_v46, 0.0  ;;  %v335_v6 = vmax.f32 %v321_v47, 0.0 }
 0x129   :  { %v240_v10 = vadd.f32 %v239_v8, %v1790_v62  ;;  %v268_v11 = vpop.f32.mrf.mxu1 }
 0x12a   :  { %v269_v15 = vadd.f32 %v268_v11, %v1790_v62  ;;  %v370_v18 = vmul.f32 %v1800_v12, %v334_v3  ;;  %v371_v20 = vmul.f32 %v1800_v12, %v335_v6  ;;  %v778_v3 = vld.sshfl [vmem:[#allocation1] sm:$0xff pattern:$0x75316420] }
 0x12b   :  { %v340_v21 = vmax.f32 %v240_v10, 0.0 }
 0x12c   :  { %v341_v25 = vmax.f32 %v269_v15, 0.0 }
 0x12d   :  { %v294_v22 = vpop.f32.mrf.mxu2  ;;  %v323_v23 = vpop.f32.mrf.mxu3  ;;  %v376_v33 = vmul.f32 %v1806_v26, %v340_v21 }
 0x12e   :  { %v377_v38 = vmul.f32 %v1806_v26, %v341_v25  ;;  %v295_v39 = vadd.f32 %v294_v22, %v1792_v1  ;;  %v324_v43 = vadd.f32 %v323_v23, %v1792_v1 }
 0x12f   :  { %v385_v49 = vadd.f32 %v384_v41, %v376_v33 }
 0x130   :  { %v242_v29 = vpop.f32.mrf.mxu0  ;;  %v394_v55 = vadd.f32 %v393_v45, %v377_v38  ;;  %v338_v60 = vmax.f32 %v295_v39, 0.0  ;;  %v339_v63 = vmax.f32 %v324_v43, 0.0 }
 0x131   :  { %v243_v32 = vadd.f32 %v242_v29, %v1794_v2  ;;  %v271_v34 = vpop.f32.mrf.mxu1 }
 0x132   :  { %v272_v36 = vadd.f32 %v271_v34, %v1794_v2  ;;  %v374_v11 = vmul.f32 %v1804_v19, %v338_v60  ;;  %v375_v15 = vmul.f32 %v1804_v19, %v339_v63 }
 0x133   :  { %v344_v40 = vmax.f32 %v243_v32, 0.0 }
 0x134   :  { %v345_v44 = vmax.f32 %v272_v36, 0.0  ;;  %v402_v30 = vadd.f32 %v374_v11, %v370_v18  ;;  %v411_v32 = vadd.f32 %v375_v15, %v371_v20 }
 0x135   :  { %v380_v48 = vmul.f32 %v1817_v42, %v344_v40  ;;  %v297_v50 = vpop.f32.mrf.mxu2  ;;  %v326_v51 = vpop.f32.mrf.mxu3 }
 0x136   :  { %v381_v53 = vmul.f32 %v1817_v42, %v345_v44  ;;  %v298_v56 = vadd.f32 %v297_v50, %v1790_v62  ;;  %v327_v58 = vadd.f32 %v326_v51, %v1790_v62  ;;  %v1517_v44 = vld [vmem:[%s2149_s0 + $0x38] sm:$0xff] }
 0x137   :  { %v386_v61 = vadd.f32 %v385_v49, %v380_v48  ;;  %v1843_v49 = vld.sshfl [vmem:[#allocation1 + $0x10] sm:$0xff pattern:$0x75316420]  ;;  %v1845_v50 = vld.sshfl [vmem:[#allocation1 + $0x18] sm:$0xff pattern:$0x75316420] }
 0x138   :  { %v395_v0 = vadd.f32 %v394_v55, %v381_v53  ;;  %v486_v5 = vpop.f32.mrf.mxu0  ;;  %v342_v4 = vmax.f32 %v298_v56, 0.0  ;;  %v343_v10 = vmax.f32 %v327_v58, 0.0  ;;  %1098 = vst [vmem:[#allocation1 + $0x10] ss:$2 sm:$0xff] %v1517_v44  ;;  %v444_v44 = vlaneseq }
 0x139   :  { %v509_v8 = vpop.f32.mrf.mxu1  ;;  %v387_v14 = vrot.slane %v386_v61, 4  ;;  %v487_v33 = vadd.f32 %v486_v5, %v1694_v27 }
 0x13a   :  { %v396_v9 = vrot.slane %v395_v0, 4  ;;  %v378_v21 = vmul.f32 %v1806_v26, %v342_v4  ;;  %v379_v25 = vmul.f32 %v1806_v26, %v343_v10  ;;  %v510_v40 = vadd.f32 %v509_v8, %v1694_v27  ;;  %v423_v8 = vpop.permute.xlu1 %422  ;;  %v1516_v10 = vld [vmem:[%s2149_s0 + $0x30] sm:$0xff] }
 0x13b   :  { %v388_v31 = vadd.f32 %v387_v14, %v386_v61  ;;  %v561_v61 = vmax.f32 %v487_v33, 0.0  ;;  %v1852_v18 = vperm.slane %v423_v8, 0  ;;  %vm1874_vm6 = vcmp.lt.s32.totalorder %v444_v44, 512 }
 0x13c   :  { %v397_v16 = vadd.f32 %v396_v9, %v395_v0  ;;  %v403_v39 = vadd.f32 %v402_v30, %v378_v21  ;;  %v412_v45 = vadd.f32 %v411_v32, %v379_v25  ;;  %v562_v63 = vmax.f32 %v510_v40, 0.0  ;;  %v779_v9 = vld.sshfl [vmem:[#allocation1 + $0x8] sm:$0xff pattern:$0x75316420] }
 0x13d   :  { %v300_v22 = vpop.f32.mrf.mxu2  ;;  %v329_v23 = vpop.f32.mrf.mxu3  ;;  %v389_v51 = vrot.slane %v388_v31, 2  ;;  %1096 = vst [vmem:[#allocation1] ss:$2 sm:$0xff] %v1516_v10 }
 0x13e   :  { %v398_v24 = vrot.slane %v397_v16, 2  ;;  %v301_v28 = vadd.f32 %v300_v22, %v1794_v2  ;;  %v330_v29 = vadd.f32 %v329_v23, %v1794_v2 }
 0x13f   :  { %v390_v11 = vadd.f32 %v389_v51, %v388_v31 }
 0x140   :  { %v346_v34 = vmax.f32 %v301_v28, 0.0  ;;  %v347_v35 = vmax.f32 %v330_v29, 0.0  ;;  %v489_v36 = vpop.f32.mrf.mxu0  ;;  %v399_v38 = vadd.f32 %v398_v24, %v397_v16 }
 0x141   :  { %v490_v41 = vadd.f32 %v489_v36, %v1683_v17  ;;  %v512_v43 = vpop.f32.mrf.mxu1  ;;  %v391_v22 = vrot.slane %v390_v11, 1 }
 0x142   :  { %v382_v46 = vmul.f32 %v1817_v42, %v346_v34  ;;  %v383_v47 = vmul.f32 %v1817_v42, %v347_v35  ;;  %v513_v48 = vadd.f32 %v512_v43, %v1683_v17  ;;  %v400_v60 = vrot.slane %v399_v38, 1 }
 0x143   :  { %v565_v53 = vmax.f32 %v490_v41, 0.0  ;;  %v392_v36 = vadd.f32 %v391_v22, %v390_v11 }
 0x144   :  { %v404_v55 = vadd.f32 %v403_v39, %v382_v46  ;;  %v413_v56 = vadd.f32 %v412_v45, %v383_v47  ;;  %v566_v58 = vmax.f32 %v513_v48, 0.0  ;;  %v401_v16 = vadd.f32 %v400_v60, %v399_v38 }
 0x145   :  { %v532_v0 = vpop.f32.mrf.mxu2  ;;  %v555_v5 = vpop.f32.mrf.mxu3  ;;  %583 = vmatpush.msrb.mxu0 %v565_v53  ;;  %v426_v51 = vadd.f32 %v1852_v18, %v392_v36 }
 0x146   :  { %v405_v6 = vrot.slane %v404_v55, 4  ;;  %v414_v4 = vrot.slane %v413_v56, 4  ;;  %612 = vmatpush.msrb.mxu1 %v566_v58  ;;  %v533_v25 = vadd.f32 %v532_v0, %v1694_v27  ;;  %v556_v28 = vadd.f32 %v555_v5, %v1694_v27 }
 0x147   :  { %584 = vmatpush.msrb.mxu0 %v561_v61  ;;  %v427_v31 = vadd.f32 %v1852_v18, %v401_v16 }
 0x148   :  { %v406_v14 = vadd.f32 %v405_v6, %v404_v55  ;;  %v415_v15 = vadd.f32 %v414_v4, %v413_v56  ;;  %613 = vmatpush.msrb.mxu1 %v562_v63  ;;  %1470 = vmatmul.msk.f32.vlgmr.msrb.gmra.mxu0 %vm203_vm2, %v1703_v37  ;;  %v563_v43 = vmax.f32 %v533_v25, 0.0  ;;  %v564_v45 = vmax.f32 %v556_v28, 0.0 }
 0x149   :  { %1474 = vmatmul.msk.f32.vlgmr.msrb.gmra.mxu1 %vm203_vm2, %v1703_v37  ;;  %1488 = vmatpush.msk.msra.mxu0 %vm74_vm0, %v778_v3  ;;  %v434_v48 = vrot.slane %v427_v31, 7 }
 0x14a   :  { %v407_v20 = vrot.slane %v406_v14, 2  ;;  %v416_v21 = vrot.slane %v415_v15, 2  ;;  %1491 = vmatpush.msk.msra.mxu1 %vm74_vm0, %v779_v9 }
 0x14b   :  { %v438_v58 = vsel %vm437_vm3, %v426_v51, %v434_v48 }
 0x14c   :  { %v408_v23 = vadd.f32 %v407_v20, %v406_v14  ;;  %v417_v24 = vadd.f32 %v416_v21, %v415_v15 }
 0x14d   :  { %v535_v29 = vpop.f32.mrf.mxu2  ;;  %v558_v30 = vpop.f32.mrf.mxu3 }
 0x14e   :  { %v409_v32 = vrot.slane %v408_v23, 1  ;;  %v418_v33 = vrot.slane %v417_v24, 1  ;;  %v536_v34 = vadd.f32 %v535_v29, %v1683_v17  ;;  %v559_v35 = vadd.f32 %v558_v30, %v1683_v17 }
 0x150   :  { %v410_v38 = vadd.f32 %v409_v32, %v408_v23  ;;  %v419_v39 = vadd.f32 %v418_v33, %v417_v24  ;;  %v567_v40 = vmax.f32 %v536_v34, 0.0  ;;  %v568_v41 = vmax.f32 %v559_v35, 0.0  ;;  %1471 = vmatmul.msk.f32.gmra.mxu0 %vm203_vm2, %v1721_v52 }
 0x151   :  { %1475 = vmatmul.msk.f32.gmra.mxu1 %vm203_vm2, %v1721_v52 }
 0x152   :  { %641 = vmatpush.msrb.mxu2 %v567_v40  ;;  %670 = vmatpush.msrb.mxu3 %v568_v41  ;;  %v428_v46 = vadd.f32 %v1852_v18, %v410_v38  ;;  %v429_v47 = vadd.f32 %v1852_v18, %v419_v39 }
 0x154   :  { %642 = vmatpush.msrb.mxu2 %v563_v43  ;;  %671 = vmatpush.msrb.mxu3 %v564_v45  ;;  %v435_v53 = vrot.slane %v428_v46, 6  ;;  %v436_v55 = vrot.slane %v429_v47, 5 }
 0x155   :  { %1478 = vmatmul.msk.f32.vlgmr.msrb.gmra.mxu2 %vm203_vm2, %v1703_v37  ;;  %1482 = vmatmul.msk.f32.vlgmr.msrb.gmra.mxu3 %vm203_vm2, %v1703_v37 }
 0x156   :  { %1494 = vmatpush.msk.msra.mxu2 %vm74_vm0, %v1843_v49  ;;  %1497 = vmatpush.msk.msra.mxu3 %vm74_vm0, %v1845_v50  ;;  %v440_v60 = vsel %vm439_vm4, %v435_v53, %v436_v55 }
 0x157   :  { %v442_v61 = vsel %vm441_vm5, %v438_v58, %v440_v60 }
 0x158   :  { %1472 = vmatmul.msk.f32.gmra.mxu0 %vm203_vm2, %v1739_v54  ;;  %448 = vst.msk [vmem:[#allocation3] sm:$0xf] %vm1874_vm6, %v442_v61 }
 0x159   :  { %1476 = vmatmul.msk.f32.gmra.mxu1 %vm203_vm2, %v1739_v54 }
 0x15d   :  { %1479 = vmatmul.msk.f32.gmra.mxu2 %vm203_vm2, %v1721_v52  ;;  %1483 = vmatmul.msk.f32.gmra.mxu3 %vm203_vm2, %v1721_v52 }
 0x160   :  { %1473 = vmatmul.msk.f32.gmra.mxu0 %vm203_vm2, %v1755_v57 }
 0x161   :  { %1477 = vmatmul.msk.f32.gmra.mxu1 %vm203_vm2, %v1755_v57 }
 0x165   :  { %1480 = vmatmul.msk.f32.gmra.mxu2 %vm203_vm2, %v1739_v54  ;;  %1484 = vmatmul.msk.f32.gmra.mxu3 %vm203_vm2, %v1739_v54 }
 0x168   :  { %1489 = vmatmul.msk.f32.vlgmr.msra.gmra.mxu0 %vm67_vm1, %v1644_v7 }
 0x169   :  { %1492 = vmatmul.msk.f32.vlgmr.msra.gmra.mxu1 %vm67_vm1, %v1644_v7 }
 0x16d   :  { %1481 = vmatmul.msk.f32.gmra.mxu2 %vm203_vm2, %v1755_v57  ;;  %1485 = vmatmul.msk.f32.gmra.mxu3 %vm203_vm2, %v1755_v57 }
 0x170   :  { %1490 = vmatmul.msk.f32.gmra.mxu0 %vm67_vm1, %v1664_v13 }
 0x171   :  { %1493 = vmatmul.msk.f32.gmra.mxu1 %vm67_vm1, %v1664_v13 }
 0x175   :  { %1495 = vmatmul.msk.f32.vlgmr.msra.gmra.mxu2 %vm67_vm1, %v1644_v7  ;;  %1498 = vmatmul.msk.f32.vlgmr.msra.gmra.mxu3 %vm67_vm1, %v1644_v7 }
 0x17d   :  { %1496 = vmatmul.msk.f32.gmra.mxu2 %vm67_vm1, %v1664_v13  ;;  %1499 = vmatmul.msk.f32.gmra.mxu3 %vm67_vm1, %v1664_v13 }
 0x1c5   :  { %v586_v49 = vpop.f32.mrf.mxu0 }
 0x1c6   :  { %v615_v50 = vpop.f32.mrf.mxu1  ;;  %v587_v20 = vadd.f32 %v586_v49, %v1788_v59 }
 0x1c7   :  { %v616_v4 = vadd.f32 %v615_v50, %v1788_v59 }
 0x1c8   :  { %v685_v32 = vmax.f32 %v587_v20, 0.0 }
 0x1c9   :  { %v686_v15 = vmax.f32 %v616_v4, 0.0 }
 0x1ca   :  { %v701_v44 = vmul.f32 %v685_v32, %v1800_v12 }
 0x1cb   :  { %v702_v29 = vmul.f32 %v686_v15, %v1800_v12 }
 0x1cd   :  { %v589_v63 = vpop.f32.mrf.mxu0 }
 0x1ce   :  { %v618_v0 = vpop.f32.mrf.mxu1  ;;  %v590_v14 = vadd.f32 %v589_v63, %v1792_v1 }
 0x1cf   :  { %v619_v5 = vadd.f32 %v618_v0, %v1792_v1 }
 0x1d0   :  { %v689_v24 = vmax.f32 %v590_v14, 0.0 }
 0x1d1   :  { %v690_v11 = vmax.f32 %v619_v5, 0.0 }
 0x1d2   :  { %v705_v39 = vmul.f32 %v689_v24, %v1804_v19 }
 0x1d3   :  { %v706_v22 = vmul.f32 %v690_v11, %v1804_v19 }
 0x1d4   :  { %v717_v48 = vadd.f32 %v705_v39, %v701_v44 }
 0x1d5   :  { %v592_v3 = vpop.f32.mrf.mxu0  ;;  %v726_v36 = vadd.f32 %v706_v22, %v702_v29 }
 0x1d6   :  { %v621_v6 = vpop.f32.mrf.mxu1  ;;  %v593_v21 = vadd.f32 %v592_v3, %v1790_v62 }
 0x1d7   :  { %v622_v8 = vadd.f32 %v621_v6, %v1790_v62 }
 0x1d8   :  { %v644_v9 = vpop.f32.mrf.mxu2  ;;  %v673_v10 = vpop.f32.mrf.mxu3  ;;  %v693_v33 = vmax.f32 %v593_v21, 0.0 }
 0x1d9   :  { %v694_v16 = vmax.f32 %v622_v8, 0.0  ;;  %v645_v58 = vadd.f32 %v644_v9, %v1788_v59  ;;  %v674_v49 = vadd.f32 %v673_v10, %v1788_v59 }
 0x1da   :  { %v709_v45 = vmul.f32 %v693_v33, %v1806_v26 }
 0x1db   :  { %v710_v30 = vmul.f32 %v694_v16, %v1806_v26  ;;  %v687_v8 = vmax.f32 %v645_v58, 0.0  ;;  %v688_v14 = vmax.f32 %v674_v49, 0.0 }
 0x1dc   :  { %v718_v61 = vadd.f32 %v717_v48, %v709_v45 }
 0x1dd   :  { %v595_v23 = vpop.f32.mrf.mxu0  ;;  %v727_v41 = vadd.f32 %v726_v36, %v710_v30 }
 0x1de   :  { %v596_v25 = vadd.f32 %v595_v23, %v1794_v2  ;;  %v624_v28 = vpop.f32.mrf.mxu1 }
 0x1df   :  { %v625_v31 = vadd.f32 %v624_v28, %v1794_v2 }
 0x1e0   :  { %v647_v34 = vpop.f32.mrf.mxu2  ;;  %v676_v35 = vpop.f32.mrf.mxu3  ;;  %v697_v40 = vmax.f32 %v596_v25, 0.0  ;;  %v703_v25 = vmul.f32 %v687_v8, %v1800_v12 }
 0x1e1   :  { %v698_v38 = vmax.f32 %v625_v31, 0.0  ;;  %v648_v53 = vadd.f32 %v647_v34, %v1792_v1  ;;  %v677_v60 = vadd.f32 %v676_v35, %v1792_v1  ;;  %v704_v31 = vmul.f32 %v688_v14, %v1800_v12 }
 0x1e2   :  { %v713_v51 = vmul.f32 %v697_v40, %v1817_v42 }
 0x1e3   :  { %v714_v43 = vmul.f32 %v698_v38, %v1817_v42  ;;  %v691_v4 = vmax.f32 %v648_v53, 0.0  ;;  %v692_v11 = vmax.f32 %v677_v60, 0.0  ;;  %v1099_v53 = vld.sshfl [vmem:[#allocation1] sm:$0xff pattern:$0x75316420] }
 0x1e4   :  { %v719_v6 = vadd.f32 %v718_v61, %v713_v51  ;;  %v1100_v60 = vld.sshfl [vmem:[#allocation1 + $0x8] sm:$0xff pattern:$0x75316420] }
 0x1e5   :  { %v728_v46 = vadd.f32 %v727_v41, %v714_v43  ;;  %v807_v47 = vpop.f32.mrf.mxu0  ;;  %v707_v22 = vmul.f32 %v691_v4, %v1804_v19  ;;  %v708_v28 = vmul.f32 %v692_v11, %v1804_v19 }
 0x1e6   :  { %v830_v55 = vpop.f32.mrf.mxu1  ;;  %v720_v21 = vrot.slane %v719_v6, 4  ;;  %v808_v10 = vadd.f32 %v807_v47, %v1694_v27 }
 0x1e7   :  { %v729_v50 = vrot.slane %v728_v46, 4  ;;  %v831_v29 = vadd.f32 %v830_v55, %v1694_v27  ;;  %v735_v44 = vadd.f32 %v707_v22, %v703_v25 }
 0x1e8   :  { %v650_v63 = vpop.f32.mrf.mxu2  ;;  %v679_v0 = vpop.f32.mrf.mxu3  ;;  %v721_v43 = vadd.f32 %v720_v21, %v719_v6  ;;  %v882_v45 = vmax.f32 %v808_v10, 0.0 }
 0x1e9   :  { %v651_v5 = vadd.f32 %v650_v63, %v1790_v62  ;;  %v680_v3 = vadd.f32 %v679_v0, %v1790_v62  ;;  %v730_v15 = vadd.f32 %v729_v50, %v728_v46  ;;  %v744_v46 = vadd.f32 %v708_v28, %v704_v31 }
 0x1ea   :  { %v883_v47 = vmax.f32 %v831_v29, 0.0  ;;  %v722_v63 = vrot.slane %v721_v43, 2 }
 0x1eb   :  { %v695_v16 = vmax.f32 %v651_v5, 0.0  ;;  %v696_v9 = vmax.f32 %v680_v3, 0.0  ;;  %v731_v32 = vrot.slane %v730_v15, 2 }
 0x1ec   :  { %v723_v14 = vadd.f32 %v722_v63, %v721_v43 }
 0x1ed   :  { %v810_v20 = vpop.f32.mrf.mxu0  ;;  %v711_v33 = vmul.f32 %v695_v16, %v1806_v26  ;;  %v712_v38 = vmul.f32 %v696_v9, %v1806_v26  ;;  %v732_v55 = vadd.f32 %v731_v32, %v730_v15 }
 0x1ee   :  { %v811_v23 = vadd.f32 %v810_v20, %v1683_v17  ;;  %v833_v24 = vpop.f32.mrf.mxu1  ;;  %v724_v22 = vrot.slane %v723_v14, 1 }
 0x1ef   :  { %v834_v30 = vadd.f32 %v833_v24, %v1683_v17  ;;  %v736_v58 = vadd.f32 %v735_v44, %v711_v33  ;;  %v745_v61 = vadd.f32 %v744_v46, %v712_v38  ;;  %v733_v3 = vrot.slane %v732_v55, 1 }
 0x1f0   :  { %v886_v34 = vmax.f32 %v811_v23, 0.0  ;;  %v653_v35 = vpop.f32.mrf.mxu2  ;;  %v682_v36 = vpop.f32.mrf.mxu3 }
 0x1f1   :  { %v887_v39 = vmax.f32 %v834_v30, 0.0  ;;  %v654_v40 = vadd.f32 %v653_v35, %v1794_v2  ;;  %v683_v41 = vadd.f32 %v682_v36, %v1794_v2  ;;  %v734_v9 = vadd.f32 %v733_v3, %v732_v55 }
 0x1f2   :  { %904 = vmatpush.msrb.mxu0 %v886_v34  ;;  %v725_v35 = vadd.f32 %v724_v22, %v723_v14 }
 0x1f3   :  { %v699_v48 = vmax.f32 %v654_v40, 0.0  ;;  %v700_v51 = vmax.f32 %v683_v41, 0.0  ;;  %933 = vmatpush.msrb.mxu1 %v887_v39  ;;  %v754_v24 = vadd.f32 %v734_v9, %v1852_v18 }
 0x1f4   :  { %905 = vmatpush.msrb.mxu0 %v882_v45 }
 0x1f5   :  { %v715_v49 = vmul.f32 %v699_v48, %v1817_v42  ;;  %v716_v50 = vmul.f32 %v700_v51, %v1817_v42  ;;  %934 = vmatpush.msrb.mxu1 %v883_v47  ;;  %1500 = vmatmul.msk.f32.vlgmr.msrb.gmra.mxu0 %vm203_vm2, %v1703_v37  ;;  %v761_v41 = vrot.slane %v754_v24, 7  ;;  %v1101_v47 = vld.sshfl [vmem:[#allocation1 + $0x10] sm:$0xff pattern:$0x75316420]  ;;  %v753_v51 = vadd.f32 %v725_v35, %v1852_v18 }
 0x1f6   :  { %1504 = vmatmul.msk.f32.vlgmr.msrb.gmra.mxu1 %vm203_vm2, %v1703_v37  ;;  %1518 = vmatpush.msk.msra.mxu0 %vm74_vm0, %v1099_v53  ;;  %v1102_v48 = vld.sshfl [vmem:[#allocation1 + $0x18] sm:$0xff pattern:$0x75316420] }
 0x1f7   :  { %v737_v0 = vadd.f32 %v736_v58, %v715_v49  ;;  %v746_v5 = vadd.f32 %v745_v61, %v716_v50  ;;  %1521 = vmatpush.msk.msra.mxu1 %vm74_vm0, %v1100_v60  ;;  %v764_v58 = vsel %vm437_vm3, %v753_v51, %v761_v41 }
 0x1f8   :  { %v853_v6 = vpop.f32.mrf.mxu2  ;;  %v876_v4 = vpop.f32.mrf.mxu3 }
 0x1f9   :  { %v738_v8 = vrot.slane %v737_v0, 4  ;;  %v747_v11 = vrot.slane %v746_v5, 4  ;;  %v854_v25 = vadd.f32 %v853_v6, %v1694_v27  ;;  %v877_v28 = vadd.f32 %v876_v4, %v1694_v27 }
 0x1fb   :  { %v739_v15 = vadd.f32 %v738_v8, %v737_v0  ;;  %v748_v16 = vadd.f32 %v747_v11, %v746_v5  ;;  %v884_v45 = vmax.f32 %v854_v25, 0.0  ;;  %v885_v46 = vmax.f32 %v877_v28, 0.0 }
 0x1fd   :  { %v740_v20 = vrot.slane %v739_v15, 2  ;;  %v749_v21 = vrot.slane %v748_v16, 2  ;;  %1501 = vmatmul.msk.f32.gmra.mxu0 %vm203_vm2, %v1721_v52 }
 0x1fe   :  { %1505 = vmatmul.msk.f32.gmra.mxu1 %vm203_vm2, %v1721_v52 }
 0x1ff   :  { %v741_v10 = vadd.f32 %v740_v20, %v739_v15  ;;  %v750_v23 = vadd.f32 %v749_v21, %v748_v16 }
 0x200   :  { %v856_v29 = vpop.f32.mrf.mxu2  ;;  %v879_v30 = vpop.f32.mrf.mxu3 }
 0x201   :  { %v742_v31 = vrot.slane %v741_v10, 1  ;;  %v751_v32 = vrot.slane %v750_v23, 1  ;;  %v857_v33 = vadd.f32 %v856_v29, %v1683_v17  ;;  %v880_v34 = vadd.f32 %v879_v30, %v1683_v17 }
 0x203   :  { %v743_v36 = vadd.f32 %v742_v31, %v741_v10  ;;  %v752_v38 = vadd.f32 %v751_v32, %v750_v23  ;;  %v888_v39 = vmax.f32 %v857_v33, 0.0  ;;  %v889_v40 = vmax.f32 %v880_v34, 0.0 }
 0x205   :  { %v755_v43 = vadd.f32 %v743_v36, %v1852_v18  ;;  %v756_v44 = vadd.f32 %v752_v38, %v1852_v18  ;;  %962 = vmatpush.msrb.mxu2 %v888_v39  ;;  %991 = vmatpush.msrb.mxu3 %v889_v40 }
 0x206   :  { %1502 = vmatmul.msk.f32.gmra.mxu0 %vm203_vm2, %v1739_v54  ;;  %1506 = vmatmul.msk.f32.gmra.mxu1 %vm203_vm2, %v1739_v54 }
 0x207   :  { %v762_v53 = vrot.slane %v755_v43, 6  ;;  %v763_v55 = vrot.slane %v756_v44, 5  ;;  %963 = vmatpush.msrb.mxu2 %v884_v45  ;;  %992 = vmatpush.msrb.mxu3 %v885_v46 }
 0x208   :  { %1508 = vmatmul.msk.f32.vlgmr.msrb.gmra.mxu2 %vm203_vm2, %v1703_v37  ;;  %1512 = vmatmul.msk.f32.vlgmr.msrb.gmra.mxu3 %vm203_vm2, %v1703_v37 }
 0x209   :  { %1524 = vmatpush.msk.msra.mxu2 %vm74_vm0, %v1101_v47  ;;  %1527 = vmatpush.msk.msra.mxu3 %vm74_vm0, %v1102_v48  ;;  %v765_v60 = vsel %vm439_vm4, %v762_v53, %v763_v55 }
 0x20a   :  { %v766_v61 = vsel %vm441_vm5, %v764_v58, %v765_v60 }
 0x20b   :  { %769 = vst.msk [vmem:[#allocation3 + $0x4] sm:$0xf] %vm1874_vm6, %v766_v61 }
 0x20e   :  { %1503 = vmatmul.msk.f32.gmra.mxu0 %vm203_vm2, %v1755_v57  ;;  %1507 = vmatmul.msk.f32.gmra.mxu1 %vm203_vm2, %v1755_v57 }
 0x210   :  { %1509 = vmatmul.msk.f32.gmra.mxu2 %vm203_vm2, %v1721_v52  ;;  %1513 = vmatmul.msk.f32.gmra.mxu3 %vm203_vm2, %v1721_v52 }
 0x216   :  { %1519 = vmatmul.msk.f32.vlgmr.msra.gmra.mxu0 %vm67_vm1, %v1644_v7  ;;  %1522 = vmatmul.msk.f32.vlgmr.msra.gmra.mxu1 %vm67_vm1, %v1644_v7 }
 0x218   :  { %1510 = vmatmul.msk.f32.gmra.mxu2 %vm203_vm2, %v1739_v54  ;;  %1514 = vmatmul.msk.f32.gmra.mxu3 %vm203_vm2, %v1739_v54 }
 0x21e   :  { %1520 = vmatmul.msk.f32.gmra.mxu0 %vm67_vm1, %v1664_v13  ;;  %1523 = vmatmul.msk.f32.gmra.mxu1 %vm67_vm1, %v1664_v13 }
 0x220   :  { %1511 = vmatmul.msk.f32.gmra.mxu2 %vm203_vm2, %v1755_v57  ;;  %1515 = vmatmul.msk.f32.gmra.mxu3 %vm203_vm2, %v1755_v57 }
 0x228   :  { %1525 = vmatmul.msk.f32.vlgmr.msra.gmra.mxu2 %vm67_vm1, %v1644_v7  ;;  %1528 = vmatmul.msk.f32.vlgmr.msra.gmra.mxu3 %vm67_vm1, %v1644_v7 }
 0x230   :  { %1526 = vmatmul.msk.f32.gmra.mxu2 %vm67_vm1, %v1664_v13  ;;  %1529 = vmatmul.msk.f32.gmra.mxu3 %vm67_vm1, %v1664_v13 }
 0x272   :  { %v907_v54 = vpop.f32.mrf.mxu0 }
 0x273   :  { %v936_v49 = vpop.f32.mrf.mxu1  ;;  %v908_v20 = vadd.f32 %v907_v54, %v1788_v59 }
 0x274   :  { %v937_v3 = vadd.f32 %v936_v49, %v1788_v59 }
 0x275   :  { %v1006_v28 = vmax.f32 %v908_v20, 0.0 }
 0x276   :  { %v1007_v16 = vmax.f32 %v937_v3, 0.0 }
 0x277   :  { %v1022_v40 = vmul.f32 %v1006_v28, %v1800_v12 }
 0x278   :  { %v1023_v24 = vmul.f32 %v1007_v16, %v1800_v12 }
 0x27a   :  { %v910_v50 = vpop.f32.mrf.mxu0 }
 0x27b   :  { %v939_v63 = vpop.f32.mrf.mxu1  ;;  %v911_v11 = vadd.f32 %v910_v50, %v1792_v1 }
 0x27c   :  { %v940_v57 = vadd.f32 %v939_v63, %v1792_v1 }
 0x27d   :  { %v1010_v23 = vmax.f32 %v911_v11, 0.0 }
 0x27e   :  { %v1011_v4 = vmax.f32 %v940_v57, 0.0 }
 0x27f   :  { %v1026_v35 = vmul.f32 %v1010_v23, %v1804_v19 }
 0x280   :  { %v1027_v22 = vmul.f32 %v1011_v4, %v1804_v19 }
 0x281   :  { %v1038_v45 = vadd.f32 %v1026_v35, %v1022_v40 }
 0x282   :  { %v1047_v31 = vadd.f32 %v1027_v22, %v1023_v24 }
 0x283   :  { %v913_v0 = vpop.f32.mrf.mxu0  ;;  %v942_v5 = vpop.f32.mrf.mxu1 }
 0x284   :  { %v943_v6 = vadd.f32 %v942_v5, %v1790_v62  ;;  %v914_v21 = vadd.f32 %v913_v0, %v1790_v62 }
 0x286   :  { %v1015_v9 = vmax.f32 %v943_v6, 0.0  ;;  %v1014_v29 = vmax.f32 %v914_v21, 0.0 }
 0x288   :  { %v1031_v25 = vmul.f32 %v1015_v9, %v1806_v26  ;;  %v1030_v41 = vmul.f32 %v1014_v29, %v1806_v26 }
 0x28a   :  { %v1048_v39 = vadd.f32 %v1047_v31, %v1031_v25  ;;  %v1039_v46 = vadd.f32 %v1038_v45, %v1030_v41 }
 0x28b   :  { %v916_v7 = vpop.f32.mrf.mxu0  ;;  %v945_v8 = vpop.f32.mrf.mxu1 }
 0x28c   :  { %v946_v14 = vadd.f32 %v945_v8, %v1794_v2  ;;  %v965_v13 = vpop.f32.mrf.mxu2  ;;  %v994_v15 = vpop.f32.mrf.mxu3  ;;  %v917_v30 = vadd.f32 %v916_v7, %v1794_v2 }
 0x28d   :  { %v966_v48 = vadd.f32 %v965_v13, %v1788_v59  ;;  %v995_v53 = vadd.f32 %v994_v15, %v1788_v59 }
 0x28e   :  { %v1019_v10 = vmax.f32 %v946_v14, 0.0  ;;  %v1018_v43 = vmax.f32 %v917_v30, 0.0 }
 0x28f   :  { %v1008_v8 = vmax.f32 %v966_v48, 0.0  ;;  %v1009_v15 = vmax.f32 %v995_v53, 0.0 }
 0x290   :  { %v1035_v32 = vmul.f32 %v1019_v10, %v1817_v42  ;;  %v1034_v47 = vmul.f32 %v1018_v43, %v1817_v42 }
 0x291   :  { %v1024_v25 = vmul.f32 %v1008_v8, %v1800_v12  ;;  %v1025_v28 = vmul.f32 %v1009_v15, %v1800_v12 }
 0x292   :  { %v1049_v44 = vadd.f32 %v1048_v39, %v1035_v32  ;;  %v1040_v6 = vadd.f32 %v1039_v46, %v1034_v47 }
 0x293   :  { %v1128_v33 = vpop.f32.mrf.mxu0  ;;  %v1151_v34 = vpop.f32.mrf.mxu1 }
 0x294   :  { %v968_v36 = vpop.f32.mrf.mxu2  ;;  %v997_v38 = vpop.f32.mrf.mxu3  ;;  %v1050_v51 = vrot.slane %v1049_v44, 4  ;;  %v1129_v54 = vadd.f32 %v1128_v33, %v1694_v27  ;;  %v1152_v49 = vadd.f32 %v1151_v34, %v1694_v27  ;;  %v1041_v22 = vrot.slane %v1040_v6, 4 }
 0x295   :  { %v969_v55 = vadd.f32 %v968_v36, %v1792_v1  ;;  %v998_v58 = vadd.f32 %v997_v38, %v1792_v1 }
 0x296   :  { %v1051_v13 = vadd.f32 %v1050_v51, %v1049_v44  ;;  %v1203_v16 = vmax.f32 %v1129_v54, 0.0  ;;  %v1204_v9 = vmax.f32 %v1152_v49, 0.0  ;;  %v1042_v35 = vadd.f32 %v1041_v22, %v1040_v6  ;;  %v1551_v6 = vld [vmem:[%s2152_s3 + $0x10] sm:$0xff] }
 0x297   :  { %v1012_v11 = vmax.f32 %v969_v55, 0.0  ;;  %v1013_v14 = vmax.f32 %v998_v58, 0.0 }
 0x298   :  { %v1052_v24 = vrot.slane %v1051_v13, 2  ;;  %v1043_v46 = vrot.slane %v1042_v35, 2 }
 0x299   :  { %v1028_v10 = vmul.f32 %v1012_v11, %v1804_v19  ;;  %v1029_v23 = vmul.f32 %v1013_v14, %v1804_v19 }
 0x29a   :  { %v1053_v40 = vadd.f32 %v1052_v24, %v1051_v13 }
 0x29b   :  { %v1131_v60 = vpop.f32.mrf.mxu0  ;;  %v1154_v61 = vpop.f32.mrf.mxu1  ;;  %v1056_v36 = vadd.f32 %v1028_v10, %v1024_v25  ;;  %v1065_v38 = vadd.f32 %v1029_v23, %v1025_v28 }
 0x29c   :  { %v971_v50 = vpop.f32.mrf.mxu2  ;;  %v1000_v63 = vpop.f32.mrf.mxu3  ;;  %v1132_v0 = vadd.f32 %v1131_v60, %v1683_v17  ;;  %v1155_v5 = vadd.f32 %v1154_v61, %v1683_v17  ;;  %v1054_v51 = vrot.slane %v1053_v40, 1  ;;  %v1044_v61 = vadd.f32 %v1043_v46, %v1042_v35 }
 0x29d   :  { %v972_v57 = vadd.f32 %v971_v50, %v1790_v62  ;;  %v1001_v3 = vadd.f32 %v1000_v63, %v1790_v62 }
 0x29e   :  { %v1207_v4 = vmax.f32 %v1132_v0, 0.0  ;;  %v1208_v7 = vmax.f32 %v1155_v5, 0.0  ;;  %v1055_v50 = vadd.f32 %v1054_v51, %v1053_v40  ;;  %v1045_v5 = vrot.slane %v1044_v61, 1 }
 0x29f   :  { %v1016_v20 = vmax.f32 %v972_v57, 0.0  ;;  %v1017_v21 = vmax.f32 %v1001_v3, 0.0 }
 0x2a0   :  { %1225 = vmatpush.msrb.mxu0 %v1207_v4  ;;  %1254 = vmatpush.msrb.mxu1 %v1208_v7 }
 0x2a1   :  { %v1032_v31 = vmul.f32 %v1016_v20, %v1806_v26  ;;  %v1033_v32 = vmul.f32 %v1017_v21, %v1806_v26 }
 0x2a2   :  { %1226 = vmatpush.msrb.mxu0 %v1203_v16  ;;  %1255 = vmatpush.msrb.mxu1 %v1204_v9  ;;  %v1046_v9 = vadd.f32 %v1045_v5, %v1044_v61 }
 0x2a3   :  { %1530 = vmatmul.msk.f32.vlgmr.msrb.gmra.mxu0 %vm203_vm2, %v1703_v37  ;;  %1534 = vmatmul.msk.f32.vlgmr.msrb.gmra.mxu1 %vm203_vm2, %v1703_v37  ;;  %v1057_v41 = vadd.f32 %v1056_v36, %v1032_v31  ;;  %v1066_v43 = vadd.f32 %v1065_v38, %v1033_v32  ;;  %v1553_v32 = vld [vmem:[%s2152_s3] sm:$0xff]  ;;  %v1554_v36 = vld [vmem:[%s2152_s3 + $0x8] sm:$0xff] }
 0x2a4   :  { %v974_v29 = vpop.f32.mrf.mxu2  ;;  %v1003_v30 = vpop.f32.mrf.mxu3 }
 0x2a5   :  { %v975_v33 = vadd.f32 %v974_v29, %v1794_v2  ;;  %v1004_v34 = vadd.f32 %v1003_v30, %v1794_v2  ;;  %v1074_v29 = vadd.f32 %v1046_v9, %v1852_v18 }
 0x2a7   :  { %v1020_v39 = vmax.f32 %v975_v33, 0.0  ;;  %v1021_v37 = vmax.f32 %v1004_v34, 0.0 }
 0x2a9   :  { %v1036_v44 = vmul.f32 %v1020_v39, %v1817_v42  ;;  %v1037_v45 = vmul.f32 %v1021_v37, %v1817_v42 }
 0x2ab   :  { %v1058_v47 = vadd.f32 %v1057_v41, %v1036_v44  ;;  %v1067_v48 = vadd.f32 %v1066_v43, %v1037_v45  ;;  %1531 = vmatmul.msk.f32.gmra.mxu0 %vm203_vm2, %v1721_v52  ;;  %1535 = vmatmul.msk.f32.gmra.mxu1 %vm203_vm2, %v1721_v52  ;;  %v1075_v52 = vadd.f32 %v1055_v50, %v1852_v18 }
 0x2ac   :  { %v1174_v53 = vpop.f32.mrf.mxu2  ;;  %v1197_v55 = vpop.f32.mrf.mxu3 }
 0x2ad   :  { %v1059_v58 = vrot.slane %v1058_v47, 4  ;;  %v1068_v60 = vrot.slane %v1067_v48, 4  ;;  %v1175_v4 = vadd.f32 %v1174_v53, %v1694_v27  ;;  %v1198_v7 = vadd.f32 %v1197_v55, %v1694_v27 }
 0x2ae   :  { %v1082_v23 = vrot.slane %v1075_v52, 7 }
 0x2af   :  { %v1060_v54 = vadd.f32 %v1059_v58, %v1058_v47  ;;  %v1069_v49 = vadd.f32 %v1068_v60, %v1067_v48  ;;  %v1205_v28 = vmax.f32 %v1175_v4, 0.0  ;;  %v1206_v27 = vmax.f32 %v1198_v7, 0.0 }
 0x2b0   :  { %v1085_v33 = vsel %vm437_vm3, %v1074_v29, %v1082_v23 }
 0x2b1   :  { %v1061_v63 = vrot.slane %v1060_v54, 2  ;;  %v1070_v0 = vrot.slane %v1069_v49, 2 }
 0x2b3   :  { %v1062_v57 = vadd.f32 %v1061_v63, %v1060_v54  ;;  %v1071_v3 = vadd.f32 %v1070_v0, %v1069_v49  ;;  %1532 = vmatmul.msk.f32.gmra.mxu0 %vm203_vm2, %v1551_v6  ;;  %1536 = vmatmul.msk.f32.gmra.mxu1 %vm203_vm2, %v1551_v6 }
 0x2b4   :  { %v1177_v8 = vpop.f32.mrf.mxu2  ;;  %v1200_v11 = vpop.f32.mrf.mxu3 }
 0x2b5   :  { %v1063_v14 = vrot.slane %v1062_v57, 1  ;;  %v1072_v13 = vrot.slane %v1071_v3, 1  ;;  %v1178_v15 = vadd.f32 %v1177_v8, %v1683_v17  ;;  %v1201_v16 = vadd.f32 %v1200_v11, %v1683_v17  ;;  %v1552_v17 = vld [vmem:[%s2152_s3 + $0x18] sm:$0xff]  ;;  %s1582_s3 = smov [#allocation3]  }
 0x2b6   :  { %s1417_s27 = sshll.u32 %s1582_s3, 4  ;;  %s1418_s27 = int_to_ptr.vmem [resolvable:$true] %s1417_s27 }
 0x2b7   :  { %v1064_v20 = vadd.f32 %v1063_v14, %v1062_v57  ;;  %v1073_v21 = vadd.f32 %v1072_v13, %v1071_v3  ;;  %v1209_v22 = vmax.f32 %v1178_v15, 0.0  ;;  %v1210_v10 = vmax.f32 %v1201_v16, 0.0 }
 0x2b9   :  { %v1076_v24 = vadd.f32 %v1064_v20, %v1852_v18  ;;  %v1077_v25 = vadd.f32 %v1073_v21, %v1852_v18  ;;  %1283 = vmatpush.msrb.mxu2 %v1209_v22  ;;  %1312 = vmatpush.msrb.mxu3 %v1210_v10 }
 0x2bb   :  { %v1083_v30 = vrot.slane %v1076_v24, 6  ;;  %v1084_v31 = vrot.slane %v1077_v25, 5  ;;  %1284 = vmatpush.msrb.mxu2 %v1205_v28  ;;  %1313 = vmatpush.msrb.mxu3 %v1206_v27 }
 0x2bc   :  { %1533 = vmatmul.msk.f32.gmra.mxu0 %vm203_vm2, %v1552_v17  ;;  %1537 = vmatmul.msk.f32.gmra.mxu1 %vm203_vm2, %v1552_v17 }
 0x2bd   :  { %1538 = vmatmul.msk.f32.vlgmr.msrb.gmra.mxu2 %vm203_vm2, %v1553_v32  ;;  %1542 = vmatmul.msk.f32.vlgmr.msrb.gmra.mxu3 %vm203_vm2, %v1553_v32  ;;  %v1086_v34 = vsel %vm439_vm4, %v1083_v30, %v1084_v31 }
 0x2be   :  { %v1087_v35 = vsel %vm441_vm5, %v1085_v33, %v1086_v34 }
 0x2bf   :  { %1090 = vst.msk [vmem:[#allocation3 + $0x8] sm:$0xf] %vm1874_vm6, %v1087_v35 }
 0x2c5   :  { %1539 = vmatmul.msk.f32.gmra.mxu2 %vm203_vm2, %v1554_v36  ;;  %1543 = vmatmul.msk.f32.gmra.mxu3 %vm203_vm2, %v1554_v36 }
 0x2cd   :  { %1540 = vmatmul.msk.f32.gmra.mxu2 %vm203_vm2, %v1551_v6  ;;  %1544 = vmatmul.msk.f32.gmra.mxu3 %vm203_vm2, %v1551_v6 }
 0x2d5   :  { %1541 = vmatmul.msk.f32.gmra.mxu2 %vm203_vm2, %v1552_v17  ;;  %1545 = vmatmul.msk.f32.gmra.mxu3 %vm203_vm2, %v1552_v17 }
 0x320   :  { %v1257_v38 = vpop.f32.mrf.mxu1  ;;  %v1228_v39 = vpop.f32.mrf.mxu0 }
 0x321   :  { %v1258_v46 = vadd.f32 %v1257_v38, %v1788_v59  ;;  %v1229_v49 = vadd.f32 %v1228_v39, %v1788_v59 }
 0x323   :  { %v1328_v58 = vmax.f32 %v1258_v46, 0.0  ;;  %v1327_v52 = vmax.f32 %v1229_v49, 0.0 }
 0x325   :  { %v1344_v5 = vmul.f32 %v1328_v58, %v1800_v12  ;;  %v1343_v9 = vmul.f32 %v1327_v52, %v1800_v12 }
 0x328   :  { %v1260_v37 = vpop.f32.mrf.mxu1  ;;  %v1231_v40 = vpop.f32.mrf.mxu0 }
 0x329   :  { %v1261_v44 = vadd.f32 %v1260_v37, %v1792_v1  ;;  %v1232_v60 = vadd.f32 %v1231_v40, %v1792_v1 }
 0x32b   :  { %v1332_v48 = vmax.f32 %v1261_v44, 0.0  ;;  %v1331_v57 = vmax.f32 %v1232_v60, 0.0 }
 0x32d   :  { %v1348_v50 = vmul.f32 %v1332_v48, %v1804_v19  ;;  %v1347_v13 = vmul.f32 %v1331_v57, %v1804_v19 }
 0x32f   :  { %v1368_v4 = vadd.f32 %v1348_v50, %v1344_v5  ;;  %v1359_v22 = vadd.f32 %v1347_v13, %v1343_v9 }
 0x330   :  { %v1263_v41 = vpop.f32.mrf.mxu1  ;;  %v1234_v43 = vpop.f32.mrf.mxu0 }
 0x331   :  { %v1264_v47 = vadd.f32 %v1263_v41, %v1790_v62  ;;  %v1235_v63 = vadd.f32 %v1234_v43, %v1790_v62 }
 0x333   :  { %v1336_v61 = vmax.f32 %v1264_v47, 0.0  ;;  %v1335_v7 = vmax.f32 %v1235_v63, 0.0 }
 0x335   :  { %v1352_v3 = vmul.f32 %v1336_v61, %v1806_v26  ;;  %v1351_v20 = vmul.f32 %v1335_v7, %v1806_v26 }
 0x337   :  { %v1369_v15 = vadd.f32 %v1368_v4, %v1352_v3  ;;  %v1360_v25 = vadd.f32 %v1359_v22, %v1351_v20 }
 0x339   :  { %v1266_v45 = vpop.f32.mrf.mxu1  ;;  %v1237_v54 = vpop.f32.mrf.mxu0 }
 0x33a   :  { %v1267_v51 = vadd.f32 %v1266_v45, %v1794_v2  ;;  %v1238_v6 = vadd.f32 %v1237_v54, %v1794_v2 }
 0x33c   :  { %v1340_v0 = vmax.f32 %v1267_v51, 0.0  ;;  %v1339_v16 = vmax.f32 %v1238_v6, 0.0 }
 0x33e   :  { %v1356_v8 = vmul.f32 %v1340_v0, %v1817_v42  ;;  %v1355_v10 = vmul.f32 %v1339_v16, %v1817_v42 }
 0x340   :  { %v1286_v53 = vpop.f32.mrf.mxu2  ;;  %v1315_v55 = vpop.f32.mrf.mxu3  ;;  %v1370_v21 = vadd.f32 %v1369_v15, %v1356_v8  ;;  %v1361_v33 = vadd.f32 %v1360_v25, %v1355_v10 }
 0x341   :  { %v1287_v27 = vadd.f32 %v1286_v53, %v1788_v59  ;;  %v1316_v29 = vadd.f32 %v1315_v55, %v1788_v59 }
 0x342   :  { %v1371_v28 = vrot.slane %v1370_v21, 4  ;;  %v1362_v40 = vrot.slane %v1361_v33, 4 }
 0x343   :  { %v1329_v38 = vmax.f32 %v1287_v27, 0.0  ;;  %v1330_v39 = vmax.f32 %v1316_v29, 0.0 }
 0x344   :  { %v1372_v36 = vadd.f32 %v1371_v28, %v1370_v21  ;;  %v1363_v55 = vadd.f32 %v1362_v40, %v1361_v33 }
 0x345   :  { %v1345_v44 = vmul.f32 %v1329_v38, %v1800_v12  ;;  %v1346_v45 = vmul.f32 %v1330_v39, %v1800_v12 }
 0x346   :  { %v1373_v59 = vrot.slane %v1372_v36, 2  ;;  %v1364_v0 = vrot.slane %v1363_v55, 2 }
 0x348   :  { %v1289_v11 = vpop.f32.mrf.mxu2  ;;  %v1318_v14 = vpop.f32.mrf.mxu3  ;;  %v1374_v54 = vadd.f32 %v1373_v59, %v1372_v36  ;;  %v1365_v52 = vadd.f32 %v1364_v0, %v1363_v55 }
 0x349   :  { %v1290_v23 = vadd.f32 %v1289_v11, %v1792_v1  ;;  %v1319_v24 = vadd.f32 %v1318_v14, %v1792_v1 }
 0x34a   :  { %v1366_v14 = vrot.slane %v1365_v52, 1 }
 0x34b   :  { %v1333_v34 = vmax.f32 %v1290_v23, 0.0  ;;  %v1334_v35 = vmax.f32 %v1319_v24, 0.0 }
 0x34d   :  { %v1349_v41 = vmul.f32 %v1333_v34, %v1804_v19  ;;  %v1350_v43 = vmul.f32 %v1334_v35, %v1804_v19 }
 0x34f   :  { %v1377_v58 = vadd.f32 %v1349_v41, %v1345_v44  ;;  %v1386_v60 = vadd.f32 %v1350_v43, %v1346_v45 }
 0x350   :  { %v1292_v30 = vpop.f32.mrf.mxu2  ;;  %v1321_v31 = vpop.f32.mrf.mxu3 }
 0x351   :  { %v1293_v17 = vadd.f32 %v1292_v30, %v1790_v62  ;;  %v1322_v32 = vadd.f32 %v1321_v31, %v1790_v62 }
 0x353   :  { %v1337_v37 = vmax.f32 %v1293_v17, 0.0  ;;  %v1338_v1 = vmax.f32 %v1322_v32, 0.0 }
 0x355   :  { %v1353_v47 = vmul.f32 %v1337_v37, %v1806_v26  ;;  %v1354_v48 = vmul.f32 %v1338_v1, %v1806_v26  ;;  %v1375_v26 = vrot.slane %v1374_v54, 1 }
 0x357   :  { %v1378_v49 = vadd.f32 %v1377_v58, %v1353_v47  ;;  %v1387_v50 = vadd.f32 %v1386_v60, %v1354_v48  ;;  %v1376_v7 = vadd.f32 %v1375_v26, %v1374_v54 }
 0x358   :  { %v1295_v46 = vpop.f32.mrf.mxu2  ;;  %v1324_v62 = vpop.f32.mrf.mxu3 }
 0x359   :  { %v1296_v51 = vadd.f32 %v1295_v46, %v1794_v2  ;;  %v1325_v53 = vadd.f32 %v1324_v62, %v1794_v2  ;;  %v1396_v16 = vadd.f32 %v1376_v7, %v1852_v18 }
 0x35b   :  { %v1341_v61 = vmax.f32 %v1296_v51, 0.0  ;;  %v1342_v19 = vmax.f32 %v1325_v53, 0.0  ;;  %v1403_v10 = vrot.slane %v1396_v16, 7 }
 0x35d   :  { %v1357_v12 = vmul.f32 %v1341_v61, %v1817_v42  ;;  %v1358_v63 = vmul.f32 %v1342_v19, %v1817_v42  ;;  %v1367_v42 = vadd.f32 %v1366_v14, %v1365_v52 }
 0x35f   :  { %v1379_v5 = vadd.f32 %v1378_v49, %v1357_v12  ;;  %v1388_v57 = vadd.f32 %v1387_v50, %v1358_v63  ;;  %v1395_v25 = vadd.f32 %v1367_v42, %v1852_v18 }
 0x361   :  { %v1380_v3 = vrot.slane %v1379_v5, 4  ;;  %v1389_v6 = vrot.slane %v1388_v57, 4  ;;  %v1406_v29 = vsel %vm437_vm3, %v1395_v25, %v1403_v10 }
 0x363   :  { %v1381_v2 = vadd.f32 %v1380_v3, %v1379_v5  ;;  %v1390_v4 = vadd.f32 %v1389_v6, %v1388_v57 }
 0x365   :  { %v1382_v8 = vrot.slane %v1381_v2, 2  ;;  %v1391_v11 = vrot.slane %v1390_v4, 2 }
 0x367   :  { %v1383_v13 = vadd.f32 %v1382_v8, %v1381_v2  ;;  %v1392_v15 = vadd.f32 %v1391_v11, %v1390_v4 }
 0x369   :  { %v1384_v9 = vrot.slane %v1383_v13, 1  ;;  %v1393_v20 = vrot.slane %v1392_v15, 1 }
 0x36b   :  { %v1385_v21 = vadd.f32 %v1384_v9, %v1383_v13  ;;  %v1394_v22 = vadd.f32 %v1393_v20, %v1392_v15 }
 0x36d   :  { %v1397_v23 = vadd.f32 %v1385_v21, %v1852_v18  ;;  %v1398_v24 = vadd.f32 %v1394_v22, %v1852_v18 }
 0x36f   :  { %v1404_v28 = vrot.slane %v1397_v23, 6  ;;  %v1405_v27 = vrot.slane %v1398_v24, 5 }
 0x371   :  { %v1407_v30 = vsel %vm439_vm4, %v1404_v28, %v1405_v27 }
 0x372   :  { %v1408_v31 = vsel %vm441_vm5, %v1406_v29, %v1407_v30 }
 0x373   :  { %1411 = vst.msk [vmem:[#allocation3 + $0xc] sm:$0xf] %vm1874_vm6, %v1408_v31 }
 0x374   :  { %1422 = dma.vmem_to_hbm [thread:$0]  %s1418_s27, 256, %s1420_s30, [#allocation4]  }
 0x375   :  { %1579 = dma.done.wait [#allocation4], 256  }
 0x376   :  { %1580 = vsyncadd [#allocation4], 4294967040 }
 0x377   :  { %1427 = vsyncpa [#allocation4], 1 }

</bundles_post_ra>
